<compile_context>
chip_gen: v7x
topology: tpu7x:2x2x1
jax: 0.10.0
libtpu: 0.0.40
codegen_flags: <defaults>
</compile_context>

<pallas_src>
import functools
import math

import jax
import jax.numpy as jnp
from jax.experimental import pallas as pl
from jax.experimental.pallas import tpu as pltpu

HIDDEN = 32        # fc1 width fixed by the PyTorch module
LANES = 128        # TPU vreg lane width
HIDDEN_PAD = 128   # hidden padded to a full lane width (lane-dense h / W2 / b1)

# Packed-buffer indexing assumes b1/W1 rows share the 128-wide lane layout.
assert HIDDEN_PAD == LANES, "packed param layout requires HIDDEN_PAD == LANES"


def _round_up(n, m):
    return ((n + m - 1) // m) * m


def mlp_kernel(x_ref, p_ref, o_ref, *, in_features, hidden_pad, out_features):
    """One batch tile of the MLP.

    x_ref: [TB, IN] f32
    p_ref: packed params [HP + 2 + IN, 128]:
             rows [0, HP)         -> W2 (zero-padded)
             row  HP              -> b2 (zero-padded)
             row  HP + 1          -> b1 (zero-padded)
             rows [HP+2, HP+2+IN) -> W1 (zero-padded)
    o_ref: [TB, OUT] output (only the real columns are stored)
    """
    IN, HP, OUT = in_features, hidden_pad, out_features
    tb = x_ref.shape[0]
    x = x_ref[...]

    # fc1 on the VPU: K=IN (e.g. 4) would waste the MXU's systolic depth and pay
    # an MXU push/pop round trip; a short unrolled broadcast-MAC chain is cheap
    # and the kernel is memory-bound anyway.
    b1 = p_ref[HP + 1:HP + 2, :]                          # [1, HP]
    h = jnp.broadcast_to(b1, (tb, HP))
    for k in range(IN):                                   # unrolled at trace time
        h = h + x[:, k:k + 1] * p_ref[HP + 2 + k:HP + 3 + k, :]
    h = jnp.maximum(h, 0.0)

    # fc2 on the MXU: lane-dense [TB, 128] @ [128, 128], f32 accumulation.
    # (For scaled-up variants on v6e/v7x, cast h/W2 to bf16 here and keep
    #  preferred_element_type=f32; kept f32 to match the f32 PyTorch module.)
    w2 = p_ref[0:HP, :]                                   # [HP, 128], 8-aligned rows
    b2 = p_ref[HP:HP + 1, :]                              # [1, 128]
    out = jnp.dot(h, w2, preferred_element_type=jnp.float32) + b2

    # Store only the real output columns (narrow masked store; the VST slot has
    # slack and this cuts HBM write traffic ~LANES/OUT x).
    o_ref[...] = out[:, :OUT].astype(o_ref.dtype)


def pack_params(w1, b1, w2, b2, hidden_pad=HIDDEN_PAD, out_pad=LANES):
    """Zero-pad and pack all params into one lane-dense [HP+2+IN, 128] f32 buffer.

    Call ONCE per weight update and reuse the result across forward calls.
    """
    in_features, hidden = w1.shape
    out_features = w2.shape[1]
    assert hidden <= hidden_pad and out_features <= out_pad
    f32 = jnp.float32
    w2p = jnp.zeros((hidden_pad, out_pad), f32).at[:hidden, :out_features].set(w2)
    b2p = jnp.zeros((1, out_pad), f32).at[:, :out_features].set(b2.reshape(1, -1))
    b1p = jnp.zeros((1, hidden_pad), f32).at[:, :hidden].set(b1.reshape(1, -1))
    w1p = jnp.zeros((in_features, hidden_pad), f32).at[:, :hidden].set(w1)
    # W2 first so its [128,128] block starts on an 8-aligned sublane boundary.
    return jnp.concatenate([w2p, b2p, b1p, w1p], axis=0)


def mlp_forward(x, packed_params, out_features, *, block_b=512):
    """relu(x @ w1 + b1) @ w2 + b2 over a 1-D grid of batch tiles.

    `packed_params` is the output of pack_params() (built once, reused here).
    """
    B, in_features = x.shape

    # Batch tiling: big tiles amortize per-step pipeline overhead; cap at
    # ceil(B/2) (rounded to the 8-sublane minimum) so large batches keep >= 2
    # grid steps for the 'parallel' axis to shard across v7x's two TensorCores.
    tb = min(block_b, _round_up(max(pl.cdiv(B, 2), 1), 8))
    grid = (pl.cdiv(B, tb),)   # ragged last tile: OOB reads padded, OOB writes dropped

    kernel = functools.partial(
        mlp_kernel,
        in_features=in_features,
        hidden_pad=HIDDEN_PAD,
        out_features=out_features,
    )

    return pl.pallas_call(
        kernel,
        out_shape=jax.ShapeDtypeStruct((B, out_features), x.dtype),
        grid=grid,
        in_specs=[
            pl.BlockSpec((tb, in_features), lambda i: (i, 0)),        # batch tile of x
            pl.BlockSpec(packed_params.shape, lambda i: (0, 0)),      # VMEM-resident params
        ],
        out_specs=pl.BlockSpec((tb, out_features), lambda i: (i, 0)),  # narrow real output
        compiler_params=pltpu.CompilerParams(
            dimension_semantics=("parallel",)),                        # shard tiles over TCs
    )(x, packed_params)


def init_mlp_params(key, input_size, output_size, hidden=HIDDEN, dtype=jnp.float32):
    """Deterministic init mirroring nn.Linear's Kaiming-uniform default.
    Weights stored as [in, out] (transposed vs PyTorch's [out, in])."""
    k1, k2, k3, k4 = jax.random.split(key, 4)
    bound1 = 1.0 / math.sqrt(input_size)
    bound2 = 1.0 / math.sqrt(hidden)
    w1 = jax.random.uniform(k1, (input_size, hidden), dtype, -bound1, bound1)
    b1 = jax.random.uniform(k2, (1, hidden), dtype, -bound1, bound1)
    w2 = jax.random.uniform(k3, (hidden, output_size), dtype, -bound2, bound2)
    b2 = jax.random.uniform(k4, (1, output_size), dtype, -bound2, bound2)
    return w1, b1, w2, b2


def reference_forward(x, w1, b1, w2, b2):
    h = jnp.maximum(x @ w1 + b1, 0.0)
    return h @ w2 + b2


if __name__ == "__main__":
    key = jax.random.PRNGKey(0)
    kx_small, kx_big, kx_odd, kp = jax.random.split(key, 4)

    input_size = 4     # small DQN observation dim
    output_size = 2    # number of actions
    w1, b1, w2, b2 = init_mlp_params(kp, input_size, output_size)

    # Pack parameters ONCE (per weight update); reused across all forward calls.
    packed = pack_params(w1, b1, w2, b2)

    # Small batch: single grid step, 8-row tile.
    x_small = jax.random.normal(kx_small, (8, input_size), jnp.float32)
    out_small = jax.block_until_ready(mlp_forward(x_small, packed, output_size))
    ref_small = reference_forward(x_small, w1, b1, w2, b2)
    assert out_small.shape == (8, output_size)
    assert jnp.allclose(out_small, ref_small, atol=1e-4, rtol=1e-4)

    # Larger batch: tb capped at ceil(B/2) -> 2 grid steps (both v7x TCs busy).
    x_big = jax.random.normal(kx_big, (384, input_size), jnp.float32)
    out_big = jax.block_until_ready(mlp_forward(x_big, packed, output_size))
    ref_big = reference_forward(x_big, w1, b1, w2, b2)
    assert out_big.shape == (384, output_size)
    assert jnp.allclose(out_big, ref_big, atol=1e-4, rtol=1e-4)

    # Ragged batch (not a multiple of the tile): exercises OOB-read padding and
    # dropped OOB writes on the last grid step, with no wrapper pad/slice.
    x_odd = jax.random.normal(kx_odd, (300, input_size), jnp.float32)
    out_odd = jax.block_until_ready(mlp_forward(x_odd, packed, output_size))
    ref_odd = reference_forward(x_odd, w1, b1, w2, b2)
    assert out_odd.shape == (300, output_size)
    assert jnp.allclose(out_odd, ref_odd, atol=1e-4, rtol=1e-4)

    print("KERNEL_OK")
</pallas_src>

<mosaic_0001>
module attributes {stable_mosaic.version = 11 : i64} {
  func.func @mlp_kernel(%arg0: i32, %arg1: memref<8x4xf32, #tpu.memory_space<vmem>>, %arg2: memref<134x128xf32, #tpu.memory_space<vmem>>, %arg3: memref<8x2xf32, #tpu.memory_space<vmem>>) attributes {dimension_semantics = [#tpu.dimension_semantics<parallel>], iteration_bounds = array<i64: 1>, scalar_prefetch = 0 : i64, scratch_operands = 0 : i64, tpu.core_type = #tpu.core_type<tc>, window_params = [{transform_indices = @transform_0, window_bounds = array<i64: 8, 4>}, {pipeline_mode = #tpu.pipeline_mode<synchronous>, transform_indices = @transform_1, window_bounds = array<i64: 134, 128>}, {transform_indices = @transform_2, window_bounds = array<i64: 8, 2>}]} {
    %c0 = arith.constant 0 : index
    %c0_0 = arith.constant 0 : index
    %0 = vector.load %arg1[%c0, %c0_0] : memref<8x4xf32, #tpu.memory_space<vmem>>, vector<8x4xf32>
    %c129 = arith.constant 129 : index
    %c0_1 = arith.constant 0 : index
    %1 = vector.load %arg2[%c129, %c0_1] : memref<134x128xf32, #tpu.memory_space<vmem>>, vector<1x128xf32>
    %2 = vector.shape_cast %1 : vector<1x128xf32> to vector<1x128xf32>
    %3 = vector.broadcast %2 : vector<1x128xf32> to vector<8x128xf32>
    %4 = vector.extract_strided_slice %0 {offsets = [0, 0], sizes = [8, 1], strides = [1, 1]} : vector<8x4xf32> to vector<8x1xf32>
    %c130 = arith.constant 130 : index
    %c0_2 = arith.constant 0 : index
    %5 = vector.load %arg2[%c130, %c0_2] : memref<134x128xf32, #tpu.memory_space<vmem>>, vector<1x128xf32>
    %6 = vector.broadcast %4 : vector<8x1xf32> to vector<8x128xf32>
    %7 = vector.broadcast %5 : vector<1x128xf32> to vector<8x128xf32>
    %8 = arith.mulf %6, %7 : vector<8x128xf32>
    %9 = arith.addf %3, %8 : vector<8x128xf32>
    %10 = vector.extract_strided_slice %0 {offsets = [0, 1], sizes = [8, 1], strides = [1, 1]} : vector<8x4xf32> to vector<8x1xf32>
    %c131 = arith.constant 131 : index
    %c0_3 = arith.constant 0 : index
    %11 = vector.load %arg2[%c131, %c0_3] : memref<134x128xf32, #tpu.memory_space<vmem>>, vector<1x128xf32>
    %12 = vector.broadcast %10 : vector<8x1xf32> to vector<8x128xf32>
    %13 = vector.broadcast %11 : vector<1x128xf32> to vector<8x128xf32>
    %14 = arith.mulf %12, %13 : vector<8x128xf32>
    %15 = arith.addf %9, %14 : vector<8x128xf32>
    %16 = vector.extract_strided_slice %0 {offsets = [0, 2], sizes = [8, 1], strides = [1, 1]} : vector<8x4xf32> to vector<8x1xf32>
    %c132 = arith.constant 132 : index
    %c0_4 = arith.constant 0 : index
    %17 = vector.load %arg2[%c132, %c0_4] : memref<134x128xf32, #tpu.memory_space<vmem>>, vector<1x128xf32>
    %18 = vector.broadcast %16 : vector<8x1xf32> to vector<8x128xf32>
    %19 = vector.broadcast %17 : vector<1x128xf32> to vector<8x128xf32>
    %20 = arith.mulf %18, %19 : vector<8x128xf32>
    %21 = arith.addf %15, %20 : vector<8x128xf32>
    %22 = vector.extract_strided_slice %0 {offsets = [0, 3], sizes = [8, 1], strides = [1, 1]} : vector<8x4xf32> to vector<8x1xf32>
    %c133 = arith.constant 133 : index
    %c0_5 = arith.constant 0 : index
    %23 = vector.load %arg2[%c133, %c0_5] : memref<134x128xf32, #tpu.memory_space<vmem>>, vector<1x128xf32>
    %24 = vector.broadcast %22 : vector<8x1xf32> to vector<8x128xf32>
    %25 = vector.broadcast %23 : vector<1x128xf32> to vector<8x128xf32>
    %26 = arith.mulf %24, %25 : vector<8x128xf32>
    %27 = arith.addf %21, %26 : vector<8x128xf32>
    %cst = arith.constant 0.000000e+00 : f32
    %28 = vector.broadcast %cst : f32 to vector<8x128xf32>
    %29 = arith.maximumf %27, %28 : vector<8x128xf32>
    %c0_6 = arith.constant 0 : index
    %c0_7 = arith.constant 0 : index
    %30 = vector.load %arg2[%c0_6, %c0_7] : memref<134x128xf32, #tpu.memory_space<vmem>>, vector<128x128xf32>
    %c128 = arith.constant 128 : index
    %c0_8 = arith.constant 0 : index
    %31 = vector.load %arg2[%c128, %c0_8] : memref<134x128xf32, #tpu.memory_space<vmem>>, vector<1x128xf32>
    %cst_9 = arith.constant dense<0.000000e+00> : vector<8x128xf32>
    %32 = tpu.matmul %29, %30, %cst_9 {dimension_numbers = #tpu.dot_dimension_numbers<[1], [0], [0], [1], [0, 0, 1, 1], [], []>} : vector<8x128xf32>, vector<128x128xf32>, vector<8x128xf32> -> vector<8x128xf32>
    %33 = vector.broadcast %31 : vector<1x128xf32> to vector<8x128xf32>
    %34 = arith.addf %32, %33 : vector<8x128xf32>
    %35 = vector.extract_strided_slice %34 {offsets = [0, 0], sizes = [8, 2], strides = [1, 1]} : vector<8x128xf32> to vector<8x2xf32>
    %c0_10 = arith.constant 0 : index
    %c0_11 = arith.constant 0 : index
    %36 = vector.load %arg3[%c0_10, %c0_11] : memref<8x2xf32, #tpu.memory_space<vmem>>, vector<8x2xf32>
    tpu.vector_store %arg3[%c0_10, %c0_11], %35 {strides = array<i32>} : memref<8x2xf32, #tpu.memory_space<vmem>>, vector<8x2xf32>,
    return
  }
  func.func @transform_0(%arg0: i32) -> (i32, i32) {
    %c0_i32 = arith.constant 0 : i32
    %c0_i32_0 = arith.constant 0 : i32
    return %arg0, %c0_i32 : i32, i32
  }
  func.func @transform_1(%arg0: i32) -> (i32, i32) {
    %c0_i32 = arith.constant 0 : i32
    %c0_i32_0 = arith.constant 0 : i32
    %c0_i32_1 = arith.constant 0 : i32
    return %c0_i32, %c0_i32_0 : i32, i32
  }
  func.func @transform_2(%arg0: i32) -> (i32, i32) {
    %c0_i32 = arith.constant 0 : i32
    %c0_i32_0 = arith.constant 0 : i32
    return %arg0, %c0_i32 : i32, i32
  }
}

</mosaic_0001>

<bundles_post_ra>
// kernel: tpu_custom_call.1
= control target key start
LH: loop header
LB: loop body
LE: loop exit
PB: predicated region body
PF: predicated region fallthrough
CT: control target
= control target key end

     0   :  { %7 = vsyncpa [#allocation3], 0  ;;  %s296_s9 = smov [#allocation2]   ;;  %s339_s0 = inlined_call_operand.vmem [shape: f32[8,4], index: 0, kind: input, shape index: {}]   ;;  %s340_s1 = inlined_call_operand.hbm [shape: f32[134,128], index: 1, kind: input, shape index: {}]   ;;  %s341_s2 = inlined_call_operand.vmem [shape: f32[8,2], index: 2, kind: output, shape index: {}]  }
   0x1   :  { %s15_s10 = sshll.u32 %s296_s9, 4  ;;  %s272_s13 = scalar_lea.hbm %s340_s1, 2176  ;;  %s16_s10 = int_to_ptr.vmem [resolvable:$true] %s15_s10 }
   0x2   :  { %p273_p0 = scmp.ne.s32.totalorder %s340_s1, %s272_s13  ;;  %p276_p1 = scmp.lt.u32.totalorder %s272_s13, %s340_s1 }
   0x4   :  { %p278_p2 = pnand %p276_p1, %p273_p0 }
   0x6   :  { %281 = shalt.err (!%p278_p2)
}
   0x7   :  { %s282_s18 = scalar_lea.vmem %s16_s10, 2176  ;;  %p287_p4 = scmp.lt.s32.totalorder %s16_s10, %s16_s10 }
   0x8   :  { %p283_p3 = scmp.ne.s32.totalorder %s16_s10, %s282_s18  ;;  %p288_p5 = scmp.lt.s32.totalorder %s282_s18, %s282_s18 }
   0xa   :  { %p289_p6 = por %p288_p5, %p287_p4 }
   0xc   :  { %p290_p7 = pnand %p289_p6, %p283_p3 }
   0xe   :  { %293 = shalt.err (!%p290_p7)
}
   0xf   :  { %s297_s19 = smov 128   ;;  %s298_s20 = smov 8  }
  0x10   :  { %21 = dma.hbm_to_vmem [thread:$0]  %s340_s1, 2176, %s16_s10, [#allocation3], %s297_s19, %s297_s19, %s298_s20  }
  0x11   :  { %294 = dma.done.wait [#allocation3], 2176  }
  0x12   :  { %295 = vsyncadd [#allocation3], 4294965120  ;;  %v299_v0 = vmov 0   ;;  %v300_v1 = vmov 2   ;;  %v301_v2 = vmov 0.0|0.0   ;;  %v25_v3 = vld [vmem:[%s339_s0] sm:$0xff] }
  0x13   :  { %267 = vset.pattern.permute.xlu0 %v299_v0  ;;  %269 = vset.pattern.permute.xlu1 %v300_v1  ;;  %v77_v4 = vld [vmem:[#allocation2] sm:$0xff]  ;;  %v78_v5 = vld [vmem:[#allocation2 + $0x8] sm:$0xff]  ;;  %v79_v7 = vld [vmem:[#allocation2 + $0x10] sm:$0xff]  ;;  %v302_v12 = vmov 1   ;;  %v303_v13 = vmov 3   ;;  %vm304_vm0 = vmmov 0  }
  0x14   :  { %233 = vmatprep.subr.bf16.mxu0 %v301_v2  ;;  %34 = vperm.xlu0 %267, %v25_v3   ;;  %v234_v6 = vpack.c.bf16 %v78_v5, %v77_v4  ;;  %v80_v8 = vld [vmem:[#allocation2 + $0x18] sm:$0xff]  ;;  %v81_v10 = vld [vmem:[#allocation2 + $0x20] sm:$0xff]  ;;  %v82_v11 = vld [vmem:[#allocation2 + $0x28] sm:$0xff]  ;;  %v305_v21 = vmov 0.0   ;;  %vm168_vm1 = vcmask 15360  }
  0x15   :  { %56 = vperm.xlu1 %269, %v25_v3   ;;  %v237_v9 = vpack.c.bf16 %v80_v8, %v79_v7  ;;  %v240_v14 = vpack.c.bf16 %v82_v11, %v81_v10  ;;  %v83_v15 = vld [vmem:[#allocation2 + $0x30] sm:$0xff]  ;;  %v84_v16 = vld [vmem:[#allocation2 + $0x38] sm:$0xff]  ;;  %v85_v18 = vld [vmem:[#allocation2 + $0x40] sm:$0xff]  ;;  %230 = vmatprep.mubr.msk.f32.mxu0 %vm304_vm0, %v305_v21 }
  0x16   :  { %235 = vmatpush3.bf16.msra.mxu0 %v234_v6  ;;  %v243_v17 = vpack.c.bf16 %v84_v16, %v83_v15  ;;  %v86_v19 = vld [vmem:[#allocation2 + $0x48] sm:$0xff]  ;;  %v87_v22 = vld [vmem:[#allocation2 + $0x50] sm:$0xff]  ;;  %v88_v23 = vld [vmem:[#allocation2 + $0x58] sm:$0xff] }
  0x17   :  { %236 = vmatprep.subr.bf16.mxu0 %v301_v2  ;;  %v246_v20 = vpack.c.bf16 %v86_v19, %v85_v18  ;;  %v249_v24 = vpack.c.bf16 %v88_v23, %v87_v22  ;;  %v89_v25 = vld [vmem:[#allocation2 + $0x60] sm:$0xff]  ;;  %v90_v26 = vld [vmem:[#allocation2 + $0x68] sm:$0xff]  ;;  %v91_v28 = vld [vmem:[#allocation2 + $0x70] sm:$0xff] }
  0x18   :  { %268 = vset.pattern.permute.xlu0 %v302_v12  ;;  %v252_v27 = vpack.c.bf16 %v90_v26, %v89_v25  ;;  %v92_v29 = vld [vmem:[#allocation2 + $0x78] sm:$0xff]  ;;  %v176_v31 = vld [vmem:[#allocation2 + $0x82] ss:$0 sm:$0xff]  ;;  %v175_v35 = vld [vmem:[#allocation2 + $0x81] ss:$0 sm:$0xff] }
  0x19   :  { %270 = vset.pattern.permute.xlu1 %v303_v13  ;;  %45 = vperm.xlu0 %268, %v25_v3   ;;  %v255_v30 = vpack.c.bf16 %v92_v29, %v91_v28  ;;  %v177_v36 = vld [vmem:[#allocation2 + $0x83] ss:$0 sm:$0xff]  ;;  %v178_v37 = vld [vmem:[#allocation2 + $0x84] ss:$0 sm:$0xff]  ;;  %v179_v39 = vld [vmem:[#allocation2 + $0x85] ss:$0 sm:$0xff] }
  0x1a   :  { %67 = vperm.xlu1 %270, %v25_v3   ;;  %238 = vmatpush3.bf16.msra.mxu0 %v237_v9  ;;  %v180_v49 = vld [vmem:[#allocation2 + $0x80] ss:$0 sm:$0xff] }
  0x1b   :  { %239 = vmatprep.subr.bf16.mxu0 %v301_v2 }
  0x1d   :  { %271 = vset.pattern.permute.xlu0 %v303_v13 }
  0x1e   :  { %241 = vmatpush3.bf16.msra.mxu0 %v240_v14 }
  0x1f   :  { %242 = vmatprep.subr.bf16.mxu0 %v301_v2 }
  0x22   :  { %244 = vmatpush3.bf16.msra.mxu0 %v243_v17 }
  0x23   :  { %245 = vmatprep.subr.bf16.mxu0 %v301_v2 }
  0x26   :  { %247 = vmatpush3.bf16.msra.mxu0 %v246_v20 }
  0x27   :  { %248 = vmatprep.subr.bf16.mxu0 %v301_v2 }
  0x2a   :  { %250 = vmatpush3.bf16.msra.mxu0 %v249_v24 }
  0x2b   :  { %251 = vmatprep.subr.bf16.mxu0 %v301_v2 }
  0x2e   :  { %253 = vmatpush3.bf16.msra.mxu0 %v252_v27 }
  0x2f   :  { %254 = vmatprep.subr.bf16.mxu0 %v301_v2 }
  0x32   :  { %256 = vmatpush3.bf16.msra.mxu0 %v255_v30 }
  0x93   :  { %v35_v32 = vpop.permute.xlu0 %34 }
  0x94   :  { %v57_v33 = vpop.permute.xlu1 %56  ;;  %v41_v34 = vmul.f32 %v176_v31, %v35_v32 }
  0x95   :  { %v63_v43 = vmul.f32 %v178_v37, %v57_v33 }
  0x96   :  { %v42_v41 = vadd.f32 %v175_v35, %v41_v34 }
  0x98   :  { %v46_v38 = vpop.permute.xlu0 %45 }
  0x99   :  { %v68_v40 = vpop.permute.xlu1 %67  ;;  %v52_v42 = vmul.f32 %v177_v36, %v46_v38 }
  0x9a   :  { %v74_v45 = vmul.f32 %v179_v39, %v68_v40 }
  0x9b   :  { %v53_v44 = vadd.f32 %v52_v42, %v42_v41 }
  0x9d   :  { %v64_v46 = vadd.f32 %v63_v43, %v53_v44 }
  0x9f   :  { %v75_v47 = vadd.f32 %v74_v45, %v64_v46 }
  0xa1   :  { %v76_v48 = vmax.f32 %v75_v47, 0.0 }
  0xa3   :  { %231 = vmatmul.mubr.f32.vlgmr.msra.gmra.mrb[0].mxu0 %v76_v48 }
 0x176   :  { %v164_v50 = vpop.f32.mrb[0].mxu0 }
 0x177   :  { %v165_v51 = vadd.f32 %v180_v49, %v164_v50  ;;  %v232_v52 = vpop.f32.mrb[1].mxu0 }
 0x179   :  { %169 = vst.msk [vmem:[%s341_s2] sm:$0xff] %vm168_vm1, %v165_v51 }
 0x17a   :  { %174 = vsyncpa [#allocation3], 1 }

</bundles_post_ra>
